<compile_context>
chip_gen: v5e
topology: v5e:2x2
jax: 0.10.0
libtpu: 0.0.40
codegen_flags: <defaults>
</compile_context>

<pallas_src>
import math

import jax
import jax.numpy as jnp
from jax.experimental import pallas as pl
from jax.experimental.pallas import tpu as pltpu


def _round_up(n, m):
    return ((n + m - 1) // m) * m


def mlp_kernel(x_ref, w1_ref, b1_ref, w2_ref, b2_ref, o_ref):
    # fc1 on the packed layout: (tb, P*F) @ (P*F, P*H) -> f32 accumulator.
    h = jnp.dot(x_ref[...], w1_ref[...], preferred_element_type=jnp.float32)
    # Bias + ReLU epilogue in f32 (cheap/correct on all chips; v5e has no bf16 VPU).
    h = jnp.maximum(h + b1_ref[...], 0.0)
    # fc2: (tb, P*H) @ (P*H, P*C) -> f32 accumulator, bias in f32.
    out = jnp.dot(h.astype(w2_ref.dtype), w2_ref[...],
                  preferred_element_type=jnp.float32)
    o_ref[...] = (out + b2_ref[...]).astype(o_ref.dtype)


def simple_nn_forward(x, w1, b1, w2, b2, *, block_super=None):
    """Fused relu(x @ w1 + b1) @ w2 + b2.

    x: (B, F); w1: (F, H); b1: (1, H) or (H,); w2: (H, C); b2: (1, C) or (C,).
    Returns (B, C) float32.  `block_super` optionally forces the number of
    packed super-rows per grid step (testing only).
    """
    B, F = x.shape
    H = w1.shape[1]
    C = w2.shape[1]
    b1 = b1.reshape(1, H).astype(jnp.float32)
    b2 = b2.reshape(1, C).astype(jnp.float32)

    # Matmul-input dtype follows the activations (supply bf16 x upstream to
    # halve the dominant x DMA).  Only the tiny weights are cast here; casting
    # x in the wrapper would add a full extra HBM pass (anti-pattern).
    mm_dtype = jnp.float32 if x.dtype == jnp.float32 else x.dtype
    w1 = w1.astype(mm_dtype)
    w2 = w2.astype(mm_dtype)

    # ---- Lane-dense repack: P batch rows per super-row, block-diag weights.
    P = max(1, 128 // math.gcd(C, 128))       # P*C is a multiple of 128
    PF, PH, PC = P * F, P * H, P * C
    eye = jnp.eye(P, dtype=mm_dtype)
    w1p = jnp.kron(eye, w1)                   # (P*F, P*H) block-diagonal
    w2p = jnp.kron(eye, w2)                   # (P*H, P*C) block-diagonal
    b1p = jnp.tile(b1, (1, P))                # (1, P*H)
    b2p = jnp.tile(b2, (1, P))                # (1, P*C)

    x_bytes = jnp.dtype(mm_dtype).itemsize

    def lane_pad_bytes(n, itemsize):          # 128-lane-padded row footprint
        return _round_up(n, 128) * itemsize

    # ---- VMEM accounting (padded shapes, f32 hidden temp, double buffers).
    resident = 2 * (_round_up(PF, 8) * lane_pad_bytes(PH, x_bytes)       # w1'
                    + _round_up(PH, 8) * lane_pad_bytes(PC, x_bytes)     # w2'
                    + 8 * lane_pad_bytes(PH, 4)                          # b1'
                    + 8 * lane_pad_bytes(PC, 4))                         # b2'
    per_super = (2 * (lane_pad_bytes(PF, x_bytes)                        # x (dbl-buf)
                      + lane_pad_bytes(PC, 4))                           # out (dbl-buf)
                 + lane_pad_bytes(PH, 4))                                # f32 hidden
    vmem_limit = 28 * 1024 * 1024             # fits v7x 64 MiB phys; raises v5e's 16 MiB default
    budget = vmem_limit - resident - (2 << 20)   # headroom for compiler scratch

    n_super = -(-B // P)                      # ceil(B / P)
    # ~4 MiB of packed x per step hides step overhead even at v7x HBM speed.
    target_tb = max(8, (4 * 1024 * 1024) // lane_pad_bytes(PF, x_bytes))
    max_tb = max(8, (budget // per_super) // 8 * 8)
    # Keep >= 4 grid steps when possible so v7x's 2 TCs each get >= 2 steps.
    steps_tb = _round_up(-(-n_super // 4), 8)
    tb = max(8, (min(target_tb, max_tb, steps_tb) // 8) * 8)
    if block_super is not None:
        tb = max(8, _round_up(block_super, 8))

    n_super_p = _round_up(max(n_super, tb), tb)
    Bp = n_super_p * P
    if Bp != B:
        x = jnp.pad(x, ((0, Bp - B), (0, 0)))  # zero rows, sliced off below
    xp = x.reshape(n_super_p, PF)              # free, contiguous reshape

    grid = (n_super_p // tb,)

    flops = 2 * n_super_p * (PF * PH + PH * PC)
    bytes_accessed = (n_super_p * PF * x_bytes + PF * PH * x_bytes
                      + PH * PC * x_bytes + (PH + PC) * 4
                      + n_super_p * PC * 4)

    outp = pl.pallas_call(
        mlp_kernel,
        out_shape=jax.ShapeDtypeStruct((n_super_p, PC), jnp.float32),
        grid=grid,
        in_specs=[
            pl.BlockSpec((tb, PF), lambda i: (i, 0)),   # x: tiled over batch
            pl.BlockSpec((PF, PH), lambda i: (0, 0)),   # w1': VMEM-resident
            pl.BlockSpec((1, PH), lambda i: (0, 0)),    # b1': VMEM-resident
            pl.BlockSpec((PH, PC), lambda i: (0, 0)),   # w2': VMEM-resident
            pl.BlockSpec((1, PC), lambda i: (0, 0)),    # b2': VMEM-resident
        ],
        out_specs=pl.BlockSpec((tb, PC), lambda i: (i, 0)),
        compiler_params=pltpu.CompilerParams(
            dimension_semantics=("parallel",),          # shard batch over TCs
            vmem_limit_bytes=vmem_limit,
        ),
        cost_estimate=pl.CostEstimate(
            flops=flops, transcendentals=0, bytes_accessed=bytes_accessed),
    )(xp, w1p, b1p, w2p, b2p)

    out = outp.reshape(Bp, C)                  # free reshape back to (Bp, C)
    return out[:B] if Bp != B else out


if __name__ == "__main__":
    # Shapes implied by the module: hidden_size=10 fixed; batch=8,
    # input_size=16, num_classes=4.
    B, F, H, C = 8, 16, 10, 4

    key = jax.random.PRNGKey(0)
    kx, kw1, kb1, kw2, kb2, kx2 = jax.random.split(key, 6)

    x = jax.random.normal(kx, (B, F), dtype=jnp.float32)

    # Deterministic PyTorch-style init: U(-1/sqrt(fan_in), 1/sqrt(fan_in)).
    bound1 = 1.0 / (F ** 0.5)
    w1 = jax.random.uniform(kw1, (F, H), jnp.float32, -bound1, bound1)
    b1 = jax.random.uniform(kb1, (1, H), jnp.float32, -bound1, bound1)
    bound2 = 1.0 / (H ** 0.5)
    w2 = jax.random.uniform(kw2, (H, C), jnp.float32, -bound2, bound2)
    b2 = jax.random.uniform(kb2, (1, C), jnp.float32, -bound2, bound2)

    # 1) Small batch (single grid step, padding path for the packed layout).
    fwd = jax.jit(simple_nn_forward)
    out = fwd(x, w1, b1, w2, b2)
    jax.block_until_ready(out)
    ref = jnp.maximum(x @ w1 + b1, 0.0) @ w2 + b2
    assert out.shape == (B, C)
    assert jnp.allclose(out, ref, atol=1e-5, rtol=1e-5)

    # 2) Larger, non-multiple batch with a forced small super-row tile to
    #    exercise the multi-step batch-tiled grid and the padding/repack path.
    B2 = 1000
    x2 = jax.random.normal(kx2, (B2, F), dtype=jnp.float32)
    out2 = simple_nn_forward(x2, w1, b1, w2, b2, block_super=8)
    jax.block_until_ready(out2)
    ref2 = jnp.maximum(x2 @ w1 + b1, 0.0) @ w2 + b2
    assert out2.shape == (B2, C)
    assert jnp.allclose(out2, ref2, atol=1e-5, rtol=1e-5)

    print("KERNEL_OK")
</pallas_src>

<mosaic_0001>
module attributes {stable_mosaic.version = 11 : i64} {
  func.func @mlp_kernel(%arg0: i32, %arg1: memref<8x512xf32, #tpu.memory_space<vmem>>, %arg2: memref<512x320xf32, #tpu.memory_space<vmem>>, %arg3: memref<1x320xf32, #tpu.memory_space<vmem>>, %arg4: memref<320x128xf32, #tpu.memory_space<vmem>>, %arg5: memref<1x128xf32, #tpu.memory_space<vmem>>, %arg6: memref<8x128xf32, #tpu.memory_space<vmem>>) attributes {dimension_semantics = [#tpu.dimension_semantics<parallel>], iteration_bounds = array<i64: 1>, scalar_prefetch = 0 : i64, scratch_operands = 0 : i64, tpu.core_type = #tpu.core_type<tc>, window_params = [{transform_indices = @transform_0, window_bounds = array<i64: 8, 512>}, {pipeline_mode = #tpu.pipeline_mode<synchronous>, transform_indices = @transform_1, window_bounds = array<i64: 512, 320>}, {pipeline_mode = #tpu.pipeline_mode<synchronous>, transform_indices = @transform_2, window_bounds = array<i64: 1, 320>}, {pipeline_mode = #tpu.pipeline_mode<synchronous>, transform_indices = @transform_3, window_bounds = array<i64: 320, 128>}, {pipeline_mode = #tpu.pipeline_mode<synchronous>, transform_indices = @transform_4, window_bounds = array<i64: 1, 128>}, {transform_indices = @transform_5, window_bounds = array<i64: 8, 128>}]} {
    %c0 = arith.constant 0 : index
    %c0_0 = arith.constant 0 : index
    %0 = vector.load %arg1[%c0, %c0_0] : memref<8x512xf32, #tpu.memory_space<vmem>>, vector<8x512xf32>
    %c0_1 = arith.constant 0 : index
    %c0_2 = arith.constant 0 : index
    %1 = vector.load %arg2[%c0_1, %c0_2] : memref<512x320xf32, #tpu.memory_space<vmem>>, vector<512x320xf32>
    %cst = arith.constant dense<0.000000e+00> : vector<8x320xf32>
    %2 = tpu.matmul %0, %1, %cst {dimension_numbers = #tpu.dot_dimension_numbers<[1], [0], [0], [1], [0, 0, 1, 1], [], []>} : vector<8x512xf32>, vector<512x320xf32>, vector<8x320xf32> -> vector<8x320xf32>
    %c0_3 = arith.constant 0 : index
    %c0_4 = arith.constant 0 : index
    %3 = vector.load %arg3[%c0_3, %c0_4] : memref<1x320xf32, #tpu.memory_space<vmem>>, vector<1x320xf32>
    %4 = vector.broadcast %3 : vector<1x320xf32> to vector<8x320xf32>
    %5 = arith.addf %2, %4 : vector<8x320xf32>
    %cst_5 = arith.constant 0.000000e+00 : f32
    %6 = vector.broadcast %cst_5 : f32 to vector<8x320xf32>
    %7 = arith.maximumf %5, %6 : vector<8x320xf32>
    %c0_6 = arith.constant 0 : index
    %c0_7 = arith.constant 0 : index
    %8 = vector.load %arg4[%c0_6, %c0_7] : memref<320x128xf32, #tpu.memory_space<vmem>>, vector<320x128xf32>
    %cst_8 = arith.constant dense<0.000000e+00> : vector<8x128xf32>
    %9 = tpu.matmul %7, %8, %cst_8 {dimension_numbers = #tpu.dot_dimension_numbers<[1], [0], [0], [1], [0, 0, 1, 1], [], []>} : vector<8x320xf32>, vector<320x128xf32>, vector<8x128xf32> -> vector<8x128xf32>
    %c0_9 = arith.constant 0 : index
    %c0_10 = arith.constant 0 : index
    %10 = vector.load %arg5[%c0_9, %c0_10] : memref<1x128xf32, #tpu.memory_space<vmem>>, vector<1x128xf32>
    %11 = vector.broadcast %10 : vector<1x128xf32> to vector<8x128xf32>
    %12 = arith.addf %9, %11 : vector<8x128xf32>
    %c0_11 = arith.constant 0 : index
    %c0_12 = arith.constant 0 : index
    %13 = vector.load %arg6[%c0_11, %c0_12] : memref<8x128xf32, #tpu.memory_space<vmem>>, vector<8x128xf32>
    tpu.vector_store %arg6[%c0_11, %c0_12], %12 {strides = array<i32>} : memref<8x128xf32, #tpu.memory_space<vmem>>, vector<8x128xf32>,
    return
  }
  func.func @transform_0(%arg0: i32) -> (i32, i32) {
    %c0_i32 = arith.constant 0 : i32
    %c0_i32_0 = arith.constant 0 : i32
    return %arg0, %c0_i32 : i32, i32
  }
  func.func @transform_1(%arg0: i32) -> (i32, i32) {
    %c0_i32 = arith.constant 0 : i32
    %c0_i32_0 = arith.constant 0 : i32
    %c0_i32_1 = arith.constant 0 : i32
    return %c0_i32, %c0_i32_0 : i32, i32
  }
  func.func @transform_2(%arg0: i32) -> (i32, i32) {
    %c0_i32 = arith.constant 0 : i32
    %c0_i32_0 = arith.constant 0 : i32
    %c0_i32_1 = arith.constant 0 : i32
    return %c0_i32, %c0_i32_0 : i32, i32
  }
  func.func @transform_3(%arg0: i32) -> (i32, i32) {
    %c0_i32 = arith.constant 0 : i32
    %c0_i32_0 = arith.constant 0 : i32
    %c0_i32_1 = arith.constant 0 : i32
    return %c0_i32, %c0_i32_0 : i32, i32
  }
  func.func @transform_4(%arg0: i32) -> (i32, i32) {
    %c0_i32 = arith.constant 0 : i32
    %c0_i32_0 = arith.constant 0 : i32
    %c0_i32_1 = arith.constant 0 : i32
    return %c0_i32, %c0_i32_0 : i32, i32
  }
  func.func @transform_5(%arg0: i32) -> (i32, i32) {
    %c0_i32 = arith.constant 0 : i32
    %c0_i32_0 = arith.constant 0 : i32
    return %arg0, %c0_i32 : i32, i32
  }
}

</mosaic_0001>

<bundles_post_ra>
// kernel: simple_nn_forward.1
= control target key start
LH: loop header
LB: loop body
LE: loop exit
PB: predicated region body
PF: predicated region fallthrough
CT: control target
= control target key end

     0   :  { %vm511_vm0 = vcmask 523264   ;;  %s1349_s1 = inlined_call_operand.vmem [shape: f32[512,320], index: 1, kind: input, shape index: {}]   ;;  %s1350_s0 = inlined_call_operand.vmem [shape: f32[8,512], index: 0, kind: input, shape index: {}]   ;;  %s1351_s3 = inlined_call_operand.vmem [shape: f32[320,128], index: 3, kind: input, shape index: {}]   ;;  %s1352_s4 = inlined_call_operand.vmem [shape: f32[1,128], index: 4, kind: input, shape index: {}]   ;;  %s1353_s2 = inlined_call_operand.vmem [shape: f32[1,320], index: 2, kind: input, shape index: {}]   ;;  %s1354_s5 = inlined_call_operand.vmem [shape: f32[8,128], index: 5, kind: output, shape index: {}]  }
   0x1   :  { %v165_v0 = vld [vmem:[%s1349_s1 + $0x468] sm:$0xff]  ;;  %v162_v2 = vld [vmem:[%s1349_s1 + $0x450] sm:$0xff]  ;;  %v159_v6 = vld [vmem:[%s1349_s1 + $0x438] sm:$0xff] }
   0x2   :  { %v69_v1 = vld [vmem:[%s1349_s1 + $0x168] sm:$0xff]  ;;  %264 = vmatpush.msra.mxu2 %v165_v0  ;;  %v66_v4 = vld [vmem:[%s1349_s1 + $0x150] sm:$0xff]  ;;  %v63_v8 = vld [vmem:[%s1349_s1 + $0x138] sm:$0xff] }
   0x3   :  { %224 = vmatpush.msra.mxu0 %v69_v1  ;;  %v213_v3 = vld [vmem:[%s1349_s1 + $0x5e8] sm:$0xff]  ;;  %v210_v7 = vld [vmem:[%s1349_s1 + $0x5d0] sm:$0xff]  ;;  %v207_v10 = vld [vmem:[%s1349_s1 + $0x5b8] sm:$0xff] }
   0x4   :  { %v117_v5 = vld [vmem:[%s1349_s1 + $0x2e8] sm:$0xff]  ;;  %284 = vmatpush.msra.mxu3 %v213_v3  ;;  %265 = vmatpush.msra.mxu2 %v162_v2  ;;  %v114_v9 = vld [vmem:[%s1349_s1 + $0x2d0] sm:$0xff]  ;;  %v156_v11 = vld [vmem:[%s1349_s1 + $0x420] sm:$0xff] }
   0x5   :  { %244 = vmatpush.msra.mxu1 %v117_v5  ;;  %225 = vmatpush.msra.mxu0 %v66_v4  ;;  %v60_v12 = vld [vmem:[%s1349_s1 + $0x120] sm:$0xff]  ;;  %v111_v13 = vld [vmem:[%s1349_s1 + $0x2b8] sm:$0xff]  ;;  %v153_v16 = vld [vmem:[%s1349_s1 + $0x408] sm:$0xff] }
   0x6   :  { %285 = vmatpush.msra.mxu3 %v210_v7  ;;  %266 = vmatpush.msra.mxu2 %v159_v6  ;;  %v204_v14 = vld [vmem:[%s1349_s1 + $0x5a0] sm:$0xff]  ;;  %v57_v17 = vld [vmem:[%s1349_s1 + $0x108] sm:$0xff]  ;;  %v150_v20 = vld [vmem:[%s1349_s1 + $0x3f0] sm:$0xff] }
   0x7   :  { %245 = vmatpush.msra.mxu1 %v114_v9  ;;  %226 = vmatpush.msra.mxu0 %v63_v8  ;;  %v108_v15 = vld [vmem:[%s1349_s1 + $0x2a0] sm:$0xff]  ;;  %v201_v18 = vld [vmem:[%s1349_s1 + $0x588] sm:$0xff]  ;;  %v54_v21 = vld [vmem:[%s1349_s1 + $0xf0] sm:$0xff] }
   0x8   :  { %286 = vmatpush.msra.mxu3 %v207_v10  ;;  %267 = vmatpush.msra.mxu2 %v156_v11  ;;  %v105_v19 = vld [vmem:[%s1349_s1 + $0x288] sm:$0xff]  ;;  %v198_v22 = vld [vmem:[%s1349_s1 + $0x570] sm:$0xff]  ;;  %v147_v24 = vld [vmem:[%s1349_s1 + $0x3d8] sm:$0xff] }
   0x9   :  { %246 = vmatpush.msra.mxu1 %v111_v13  ;;  %227 = vmatpush.msra.mxu0 %v60_v12  ;;  %v102_v23 = vld [vmem:[%s1349_s1 + $0x270] sm:$0xff]  ;;  %v51_v25 = vld [vmem:[%s1349_s1 + $0xd8] sm:$0xff]  ;;  %v144_v28 = vld [vmem:[%s1349_s1 + $0x3c0] sm:$0xff] }
   0xa   :  { %287 = vmatpush.msra.mxu3 %v204_v14  ;;  %268 = vmatpush.msra.mxu2 %v153_v16  ;;  %v195_v26 = vld [vmem:[%s1349_s1 + $0x558] sm:$0xff]  ;;  %v48_v29 = vld [vmem:[%s1349_s1 + $0xc0] sm:$0xff]  ;;  %v141_v32 = vld [vmem:[%s1349_s1 + $0x3a8] sm:$0xff] }
   0xb   :  { %247 = vmatpush.msra.mxu1 %v108_v15  ;;  %228 = vmatpush.msra.mxu0 %v57_v17  ;;  %v99_v27 = vld [vmem:[%s1349_s1 + $0x258] sm:$0xff]  ;;  %v192_v30 = vld [vmem:[%s1349_s1 + $0x540] sm:$0xff]  ;;  %v45_v33 = vld [vmem:[%s1349_s1 + $0xa8] sm:$0xff] }
   0xc   :  { %288 = vmatpush.msra.mxu3 %v201_v18  ;;  %269 = vmatpush.msra.mxu2 %v150_v20  ;;  %v96_v31 = vld [vmem:[%s1349_s1 + $0x240] sm:$0xff]  ;;  %v189_v34 = vld [vmem:[%s1349_s1 + $0x528] sm:$0xff]  ;;  %v138_v36 = vld [vmem:[%s1349_s1 + $0x390] sm:$0xff] }
   0xd   :  { %248 = vmatpush.msra.mxu1 %v105_v19  ;;  %229 = vmatpush.msra.mxu0 %v54_v21  ;;  %v93_v35 = vld [vmem:[%s1349_s1 + $0x228] sm:$0xff]  ;;  %v42_v37 = vld [vmem:[%s1349_s1 + $0x90] sm:$0xff]  ;;  %v135_v40 = vld [vmem:[%s1349_s1 + $0x378] sm:$0xff] }
   0xe   :  { %289 = vmatpush.msra.mxu3 %v198_v22  ;;  %270 = vmatpush.msra.mxu2 %v147_v24  ;;  %v186_v38 = vld [vmem:[%s1349_s1 + $0x510] sm:$0xff]  ;;  %v39_v41 = vld [vmem:[%s1349_s1 + $0x78] sm:$0xff]  ;;  %v132_v44 = vld [vmem:[%s1349_s1 + $0x360] sm:$0xff] }
   0xf   :  { %249 = vmatpush.msra.mxu1 %v102_v23  ;;  %230 = vmatpush.msra.mxu0 %v51_v25  ;;  %v90_v39 = vld [vmem:[%s1349_s1 + $0x210] sm:$0xff]  ;;  %v183_v42 = vld [vmem:[%s1349_s1 + $0x4f8] sm:$0xff]  ;;  %v36_v45 = vld [vmem:[%s1349_s1 + $0x60] sm:$0xff] }
  0x10   :  { %290 = vmatpush.msra.mxu3 %v195_v26  ;;  %271 = vmatpush.msra.mxu2 %v144_v28  ;;  %v87_v43 = vld [vmem:[%s1349_s1 + $0x1f8] sm:$0xff]  ;;  %v180_v46 = vld [vmem:[%s1349_s1 + $0x4e0] sm:$0xff]  ;;  %v129_v48 = vld [vmem:[%s1349_s1 + $0x348] sm:$0xff] }
  0x11   :  { %250 = vmatpush.msra.mxu1 %v99_v27  ;;  %231 = vmatpush.msra.mxu0 %v48_v29  ;;  %v84_v47 = vld [vmem:[%s1349_s1 + $0x1e0] sm:$0xff]  ;;  %v33_v49 = vld [vmem:[%s1349_s1 + $0x48] sm:$0xff]  ;;  %v126_v52 = vld [vmem:[%s1349_s1 + $0x330] sm:$0xff] }
  0x12   :  { %291 = vmatpush.msra.mxu3 %v192_v30  ;;  %272 = vmatpush.msra.mxu2 %v141_v32  ;;  %v177_v50 = vld [vmem:[%s1349_s1 + $0x4c8] sm:$0xff]  ;;  %v30_v53 = vld [vmem:[%s1349_s1 + $0x30] sm:$0xff]  ;;  %v123_v56 = vld [vmem:[%s1349_s1 + $0x318] sm:$0xff] }
  0x13   :  { %251 = vmatpush.msra.mxu1 %v96_v31  ;;  %232 = vmatpush.msra.mxu0 %v45_v33  ;;  %v81_v51 = vld [vmem:[%s1349_s1 + $0x1c8] sm:$0xff]  ;;  %v174_v54 = vld [vmem:[%s1349_s1 + $0x4b0] sm:$0xff]  ;;  %v27_v57 = vld [vmem:[%s1349_s1 + $0x18] sm:$0xff] }
  0x14   :  { %292 = vmatpush.msra.mxu3 %v189_v34  ;;  %273 = vmatpush.msra.mxu2 %v138_v36  ;;  %v78_v55 = vld [vmem:[%s1349_s1 + $0x1b0] sm:$0xff]  ;;  %v171_v58 = vld [vmem:[%s1349_s1 + $0x498] sm:$0xff]  ;;  %v120_v60 = vld [vmem:[%s1349_s1 + $0x300] sm:$0xff] }
  0x15   :  { %252 = vmatpush.msra.mxu1 %v93_v35  ;;  %233 = vmatpush.msra.mxu0 %v42_v37  ;;  %v75_v59 = vld [vmem:[%s1349_s1 + $0x198] sm:$0xff]  ;;  %v24_v61 = vld [vmem:[%s1349_s1] sm:$0xff]  ;;  %v166_v62 = vld [vmem:[%s1349_s1 + $0x470] sm:$0xff] }
  0x16   :  { %293 = vmatpush.msra.mxu3 %v186_v38  ;;  %274 = vmatpush.msra.mxu2 %v135_v40  ;;  %v168_v63 = vld [vmem:[%s1349_s1 + $0x480] sm:$0xff]  ;;  %v70_v0 = vld [vmem:[%s1349_s1 + $0x170] sm:$0xff]  ;;  %v163_v2 = vld [vmem:[%s1349_s1 + $0x458] sm:$0xff] }
  0x17   :  { %253 = vmatpush.msra.mxu1 %v90_v39  ;;  %234 = vmatpush.msra.mxu0 %v39_v41  ;;  %v214_v1 = vld [vmem:[%s1349_s1 + $0x5f0] sm:$0xff]  ;;  %v72_v3 = vld [vmem:[%s1349_s1 + $0x180] sm:$0xff]  ;;  %v67_v4 = vld [vmem:[%s1349_s1 + $0x158] sm:$0xff] }
  0x18   :  { %294 = vmatpush.msra.mxu3 %v183_v42  ;;  %275 = vmatpush.msra.mxu2 %v132_v44  ;;  %v118_v5 = vld [vmem:[%s1349_s1 + $0x2f0] sm:$0xff]  ;;  %v160_v6 = vld [vmem:[%s1349_s1 + $0x440] sm:$0xff]  ;;  %v211_v7 = vld [vmem:[%s1349_s1 + $0x5d8] sm:$0xff] }
  0x19   :  { %254 = vmatpush.msra.mxu1 %v87_v43  ;;  %235 = vmatpush.msra.mxu0 %v36_v45  ;;  %v64_v8 = vld [vmem:[%s1349_s1 + $0x140] sm:$0xff]  ;;  %v115_v9 = vld [vmem:[%s1349_s1 + $0x2d8] sm:$0xff]  ;;  %v157_v10 = vld [vmem:[%s1349_s1 + $0x428] sm:$0xff] }
  0x1a   :  { %295 = vmatpush.msra.mxu3 %v180_v46  ;;  %276 = vmatpush.msra.mxu2 %v129_v48  ;;  %v208_v11 = vld [vmem:[%s1349_s1 + $0x5c0] sm:$0xff]  ;;  %v61_v12 = vld [vmem:[%s1349_s1 + $0x128] sm:$0xff]  ;;  %v154_v14 = vld [vmem:[%s1349_s1 + $0x410] sm:$0xff] }
  0x1b   :  { %255 = vmatpush.msra.mxu1 %v84_v47  ;;  %236 = vmatpush.msra.mxu0 %v33_v49  ;;  %v112_v13 = vld [vmem:[%s1349_s1 + $0x2c0] sm:$0xff]  ;;  %v205_v15 = vld [vmem:[%s1349_s1 + $0x5a8] sm:$0xff]  ;;  %v58_v16 = vld [vmem:[%s1349_s1 + $0x110] sm:$0xff] }
  0x1c   :  { %296 = vmatpush.msra.mxu3 %v177_v50  ;;  %277 = vmatpush.msra.mxu2 %v126_v52  ;;  %v109_v17 = vld [vmem:[%s1349_s1 + $0x2a8] sm:$0xff]  ;;  %v151_v18 = vld [vmem:[%s1349_s1 + $0x3f8] sm:$0xff]  ;;  %v202_v19 = vld [vmem:[%s1349_s1 + $0x590] sm:$0xff] }
  0x1d   :  { %256 = vmatpush.msra.mxu1 %v81_v51  ;;  %237 = vmatpush.msra.mxu0 %v30_v53  ;;  %v55_v20 = vld [vmem:[%s1349_s1 + $0xf8] sm:$0xff]  ;;  %v106_v21 = vld [vmem:[%s1349_s1 + $0x290] sm:$0xff]  ;;  %v148_v22 = vld [vmem:[%s1349_s1 + $0x3e0] sm:$0xff] }
  0x1e   :  { %297 = vmatpush.msra.mxu3 %v174_v54  ;;  %278 = vmatpush.msra.mxu2 %v123_v56  ;;  %v199_v23 = vld [vmem:[%s1349_s1 + $0x578] sm:$0xff]  ;;  %v52_v24 = vld [vmem:[%s1349_s1 + $0xe0] sm:$0xff]  ;;  %v145_v26 = vld [vmem:[%s1349_s1 + $0x3c8] sm:$0xff] }
  0x1f   :  { %257 = vmatpush.msra.mxu1 %v78_v55  ;;  %238 = vmatpush.msra.mxu0 %v27_v57  ;;  %v103_v25 = vld [vmem:[%s1349_s1 + $0x278] sm:$0xff]  ;;  %v196_v27 = vld [vmem:[%s1349_s1 + $0x560] sm:$0xff]  ;;  %v49_v28 = vld [vmem:[%s1349_s1 + $0xc8] sm:$0xff] }
  0x20   :  { %298 = vmatpush.msra.mxu3 %v171_v58  ;;  %279 = vmatpush.msra.mxu2 %v120_v60  ;;  %v100_v29 = vld [vmem:[%s1349_s1 + $0x260] sm:$0xff]  ;;  %v142_v30 = vld [vmem:[%s1349_s1 + $0x3b0] sm:$0xff]  ;;  %v193_v31 = vld [vmem:[%s1349_s1 + $0x548] sm:$0xff] }
  0x21   :  { %258 = vmatpush.msra.mxu1 %v75_v59  ;;  %239 = vmatpush.msra.mxu0 %v24_v61  ;;  %v46_v32 = vld [vmem:[%s1349_s1 + $0xb0] sm:$0xff]  ;;  %v97_v33 = vld [vmem:[%s1349_s1 + $0x248] sm:$0xff]  ;;  %v139_v34 = vld [vmem:[%s1349_s1 + $0x398] sm:$0xff] }
  0x22   :  { %344 = vmatpush.msrb.mxu2 %v166_v62  ;;  %299 = vmatpush.msra.mxu3 %v168_v63  ;;  %v190_v35 = vld [vmem:[%s1349_s1 + $0x530] sm:$0xff]  ;;  %v43_v36 = vld [vmem:[%s1349_s1 + $0x98] sm:$0xff]  ;;  %v136_v38 = vld [vmem:[%s1349_s1 + $0x380] sm:$0xff] }
  0x23   :  { %304 = vmatpush.msrb.mxu0 %v70_v0  ;;  %259 = vmatpush.msra.mxu1 %v72_v3  ;;  %v94_v37 = vld [vmem:[%s1349_s1 + $0x230] sm:$0xff]  ;;  %v187_v39 = vld [vmem:[%s1349_s1 + $0x518] sm:$0xff]  ;;  %v40_v40 = vld [vmem:[%s1349_s1 + $0x80] sm:$0xff] }
  0x24   :  { %364 = vmatpush.msrb.mxu3 %v214_v1  ;;  %345 = vmatpush.msrb.mxu2 %v163_v2  ;;  %v91_v41 = vld [vmem:[%s1349_s1 + $0x218] sm:$0xff]  ;;  %v133_v42 = vld [vmem:[%s1349_s1 + $0x368] sm:$0xff]  ;;  %v184_v43 = vld [vmem:[%s1349_s1 + $0x500] sm:$0xff] }
  0x25   :  { %305 = vmatpush.msrb.mxu0 %v67_v4  ;;  %324 = vmatpush.msrb.mxu1 %v118_v5  ;;  %v37_v44 = vld [vmem:[%s1349_s1 + $0x68] sm:$0xff]  ;;  %v88_v45 = vld [vmem:[%s1349_s1 + $0x200] sm:$0xff]  ;;  %v130_v46 = vld [vmem:[%s1349_s1 + $0x350] sm:$0xff] }
  0x26   :  { %346 = vmatpush.msrb.mxu2 %v160_v6  ;;  %365 = vmatpush.msrb.mxu3 %v211_v7  ;;  %v181_v47 = vld [vmem:[%s1349_s1 + $0x4e8] sm:$0xff]  ;;  %v951_v48 = vld [vmem:[%s1350_s0 + $0x10] sm:$0xff]  ;;  %v127_v51 = vld [vmem:[%s1349_s1 + $0x338] sm:$0xff] }
  0x27   :  { %306 = vmatpush.msrb.mxu0 %v64_v8  ;;  %325 = vmatpush.msrb.mxu1 %v115_v9  ;;  %v34_v49 = vld [vmem:[%s1349_s1 + $0x50] sm:$0xff]  ;;  %v85_v50 = vld [vmem:[%s1349_s1 + $0x1e8] sm:$0xff]  ;;  %v968_v53 = vld [vmem:[%s1350_s0] sm:$0xff] }
  0x28   :  { %347 = vmatpush.msrb.mxu2 %v157_v10  ;;  %366 = vmatpush.msrb.mxu3 %v208_v11  ;;  %v178_v52 = vld [vmem:[%s1349_s1 + $0x4d0] sm:$0xff]  ;;  %v974_v54 = vld [vmem:[%s1350_s0 + $0x18] sm:$0xff]  ;;  %v124_v57 = vld [vmem:[%s1349_s1 + $0x320] sm:$0xff] }
  0x29   :  { %307 = vmatpush.msrb.mxu0 %v61_v12  ;;  %326 = vmatpush.msrb.mxu1 %v112_v13  ;;  %v31_v55 = vld [vmem:[%s1349_s1 + $0x38] sm:$0xff]  ;;  %v82_v56 = vld [vmem:[%s1349_s1 + $0x1d0] sm:$0xff]  ;;  %v992_v59 = vld [vmem:[%s1350_s0 + $0x8] sm:$0xff] }
  0x2a   :  { %348 = vmatpush.msrb.mxu2 %v154_v14  ;;  %367 = vmatpush.msrb.mxu3 %v205_v15  ;;  %v175_v58 = vld [vmem:[%s1349_s1 + $0x4b8] sm:$0xff]  ;;  %v28_v60 = vld [vmem:[%s1349_s1 + $0x20] sm:$0xff]  ;;  %v121_v62 = vld [vmem:[%s1349_s1 + $0x308] sm:$0xff] }
  0x2b   :  { %308 = vmatpush.msrb.mxu0 %v58_v16  ;;  %327 = vmatpush.msrb.mxu1 %v109_v17  ;;  %v79_v61 = vld [vmem:[%s1349_s1 + $0x1b8] sm:$0xff]  ;;  %v172_v63 = vld [vmem:[%s1349_s1 + $0x4a0] sm:$0xff]  ;;  %v25_v1 = vld [vmem:[%s1349_s1 + $0x8] sm:$0xff] }
  0x2c   :  { %349 = vmatpush.msrb.mxu2 %v151_v18  ;;  %368 = vmatpush.msrb.mxu3 %v202_v19  ;;  %v167_v0 = vld [vmem:[%s1349_s1 + $0x478] sm:$0xff]  ;;  %v76_v2 = vld [vmem:[%s1349_s1 + $0x1a0] sm:$0xff]  ;;  %v169_v3 = vld [vmem:[%s1349_s1 + $0x488] sm:$0xff] }
  0x2d   :  { %309 = vmatpush.msrb.mxu0 %v55_v20  ;;  %328 = vmatpush.msrb.mxu1 %v106_v21  ;;  %v71_v4 = vld [vmem:[%s1349_s1 + $0x178] sm:$0xff]  ;;  %v164_v5 = vld [vmem:[%s1349_s1 + $0x460] sm:$0xff]  ;;  %v73_v7 = vld [vmem:[%s1349_s1 + $0x188] sm:$0xff] }
  0x2e   :  { %350 = vmatpush.msrb.mxu2 %v148_v22  ;;  %369 = vmatpush.msrb.mxu3 %v199_v23  ;;  %v215_v6 = vld [vmem:[%s1349_s1 + $0x5f8] sm:$0xff]  ;;  %v68_v8 = vld [vmem:[%s1349_s1 + $0x160] sm:$0xff]  ;;  %v161_v10 = vld [vmem:[%s1349_s1 + $0x448] sm:$0xff] }
  0x2f   :  { %310 = vmatpush.msrb.mxu0 %v52_v24  ;;  %329 = vmatpush.msrb.mxu1 %v103_v25  ;;  %v119_v9 = vld [vmem:[%s1349_s1 + $0x2f8] sm:$0xff]  ;;  %v212_v11 = vld [vmem:[%s1349_s1 + $0x5e0] sm:$0xff]  ;;  %v65_v12 = vld [vmem:[%s1349_s1 + $0x148] sm:$0xff] }
  0x30   :  { %351 = vmatpush.msrb.mxu2 %v145_v26  ;;  %370 = vmatpush.msrb.mxu3 %v196_v27  ;;  %v116_v13 = vld [vmem:[%s1349_s1 + $0x2e0] sm:$0xff]  ;;  %v158_v14 = vld [vmem:[%s1349_s1 + $0x430] sm:$0xff]  ;;  %v209_v15 = vld [vmem:[%s1349_s1 + $0x5c8] sm:$0xff] }
  0x31   :  { %311 = vmatpush.msrb.mxu0 %v49_v28  ;;  %330 = vmatpush.msrb.mxu1 %v100_v29  ;;  %v62_v16 = vld [vmem:[%s1349_s1 + $0x130] sm:$0xff]  ;;  %v113_v17 = vld [vmem:[%s1349_s1 + $0x2c8] sm:$0xff]  ;;  %v155_v18 = vld [vmem:[%s1349_s1 + $0x418] sm:$0xff] }
  0x32   :  { %352 = vmatpush.msrb.mxu2 %v142_v30  ;;  %371 = vmatpush.msrb.mxu3 %v193_v31  ;;  %v206_v19 = vld [vmem:[%s1349_s1 + $0x5b0] sm:$0xff]  ;;  %v59_v20 = vld [vmem:[%s1349_s1 + $0x118] sm:$0xff]  ;;  %v152_v22 = vld [vmem:[%s1349_s1 + $0x400] sm:$0xff] }
  0x33   :  { %312 = vmatpush.msrb.mxu0 %v46_v32  ;;  %331 = vmatpush.msrb.mxu1 %v97_v33  ;;  %v110_v21 = vld [vmem:[%s1349_s1 + $0x2b0] sm:$0xff]  ;;  %v203_v23 = vld [vmem:[%s1349_s1 + $0x598] sm:$0xff]  ;;  %v56_v24 = vld [vmem:[%s1349_s1 + $0x100] sm:$0xff] }
  0x34   :  { %353 = vmatpush.msrb.mxu2 %v139_v34  ;;  %372 = vmatpush.msrb.mxu3 %v190_v35  ;;  %v107_v25 = vld [vmem:[%s1349_s1 + $0x298] sm:$0xff]  ;;  %v149_v26 = vld [vmem:[%s1349_s1 + $0x3e8] sm:$0xff]  ;;  %v200_v27 = vld [vmem:[%s1349_s1 + $0x580] sm:$0xff] }
  0x35   :  { %313 = vmatpush.msrb.mxu0 %v43_v36  ;;  %332 = vmatpush.msrb.mxu1 %v94_v37  ;;  %v53_v28 = vld [vmem:[%s1349_s1 + $0xe8] sm:$0xff]  ;;  %v104_v29 = vld [vmem:[%s1349_s1 + $0x280] sm:$0xff]  ;;  %v146_v30 = vld [vmem:[%s1349_s1 + $0x3d0] sm:$0xff] }
  0x36   :  { %354 = vmatpush.msrb.mxu2 %v136_v38  ;;  %373 = vmatpush.msrb.mxu3 %v187_v39  ;;  %v197_v31 = vld [vmem:[%s1349_s1 + $0x568] sm:$0xff]  ;;  %v50_v32 = vld [vmem:[%s1349_s1 + $0xd0] sm:$0xff]  ;;  %v143_v34 = vld [vmem:[%s1349_s1 + $0x3b8] sm:$0xff] }
  0x37   :  { %314 = vmatpush.msrb.mxu0 %v40_v40  ;;  %333 = vmatpush.msrb.mxu1 %v91_v41  ;;  %v101_v33 = vld [vmem:[%s1349_s1 + $0x268] sm:$0xff]  ;;  %v194_v35 = vld [vmem:[%s1349_s1 + $0x550] sm:$0xff]  ;;  %v47_v36 = vld [vmem:[%s1349_s1 + $0xb8] sm:$0xff] }
  0x38   :  { %355 = vmatpush.msrb.mxu2 %v133_v42  ;;  %374 = vmatpush.msrb.mxu3 %v184_v43  ;;  %v98_v37 = vld [vmem:[%s1349_s1 + $0x250] sm:$0xff]  ;;  %v140_v38 = vld [vmem:[%s1349_s1 + $0x3a0] sm:$0xff]  ;;  %v191_v39 = vld [vmem:[%s1349_s1 + $0x538] sm:$0xff] }
  0x39   :  { %315 = vmatpush.msrb.mxu0 %v37_v44  ;;  %334 = vmatpush.msrb.mxu1 %v88_v45  ;;  %v44_v40 = vld [vmem:[%s1349_s1 + $0xa0] sm:$0xff]  ;;  %v95_v41 = vld [vmem:[%s1349_s1 + $0x238] sm:$0xff]  ;;  %v137_v42 = vld [vmem:[%s1349_s1 + $0x388] sm:$0xff] }
  0x3a   :  { %356 = vmatpush.msrb.mxu2 %v130_v46  ;;  %375 = vmatpush.msrb.mxu3 %v181_v47  ;;  %v188_v43 = vld [vmem:[%s1349_s1 + $0x520] sm:$0xff]  ;;  %v41_v44 = vld [vmem:[%s1349_s1 + $0x88] sm:$0xff]  ;;  %v134_v46 = vld [vmem:[%s1349_s1 + $0x370] sm:$0xff] }
  0x3b   :  { %280 = vmatmul.f32.vlgmr.msra.gmra.mxu2 %v951_v48  ;;  %316 = vmatpush.msrb.mxu0 %v34_v49  ;;  %v92_v45 = vld [vmem:[%s1349_s1 + $0x220] sm:$0xff]  ;;  %v185_v47 = vld [vmem:[%s1349_s1 + $0x508] sm:$0xff]  ;;  %v38_v49 = vld [vmem:[%s1349_s1 + $0x70] sm:$0xff] }
  0x3c   :  { %335 = vmatpush.msrb.mxu1 %v85_v50  ;;  %357 = vmatpush.msrb.mxu2 %v127_v51  ;;  %v89_v50 = vld [vmem:[%s1349_s1 + $0x208] sm:$0xff]  ;;  %v131_v51 = vld [vmem:[%s1349_s1 + $0x358] sm:$0xff] }
  0x3d   :  { %376 = vmatpush.msrb.mxu3 %v178_v52  ;;  %240 = vmatmul.f32.vlgmr.msra.gmra.mxu0 %v968_v53  ;;  %v182_v52 = vld [vmem:[%s1349_s1 + $0x4f0] sm:$0xff] }
  0x3e   :  { %300 = vmatmul.f32.vlgmr.msra.gmra.mxu3 %v974_v54  ;;  %317 = vmatpush.msrb.mxu0 %v31_v55  ;;  %v35_v55 = vld [vmem:[%s1349_s1 + $0x58] sm:$0xff] }
  0x3f   :  { %336 = vmatpush.msrb.mxu1 %v82_v56  ;;  %358 = vmatpush.msrb.mxu2 %v124_v57  ;;  %v86_v56 = vld [vmem:[%s1349_s1 + $0x1f0] sm:$0xff]  ;;  %v128_v57 = vld [vmem:[%s1349_s1 + $0x340] sm:$0xff] }
  0x40   :  { %377 = vmatpush.msrb.mxu3 %v175_v58  ;;  %260 = vmatmul.f32.vlgmr.msra.gmra.mxu1 %v992_v59  ;;  %v179_v58 = vld [vmem:[%s1349_s1 + $0x4d8] sm:$0xff] }
  0x41   :  { %318 = vmatpush.msrb.mxu0 %v28_v60  ;;  %337 = vmatpush.msrb.mxu1 %v79_v61  ;;  %v32_v60 = vld [vmem:[%s1349_s1 + $0x40] sm:$0xff]  ;;  %v83_v61 = vld [vmem:[%s1349_s1 + $0x1d8] sm:$0xff] }
  0x42   :  { %359 = vmatpush.msrb.mxu2 %v121_v62  ;;  %378 = vmatpush.msrb.mxu3 %v172_v63  ;;  %v125_v62 = vld [vmem:[%s1349_s1 + $0x328] sm:$0xff]  ;;  %v176_v63 = vld [vmem:[%s1349_s1 + $0x4c0] sm:$0xff] }
  0x43   :  { %319 = vmatpush.msrb.mxu0 %v25_v1  ;;  %338 = vmatpush.msrb.mxu1 %v76_v2  ;;  %v80_v1 = vld [vmem:[%s1349_s1 + $0x1c0] sm:$0xff]  ;;  %v122_v2 = vld [vmem:[%s1349_s1 + $0x310] sm:$0xff] }
  0x44   :  { %424 = vmatpush.msra.mxu2 %v167_v0  ;;  %379 = vmatpush.msrb.mxu3 %v169_v3  ;;  %v29_v0 = vld [vmem:[%s1349_s1 + $0x28] sm:$0xff] }
  0x45   :  { %360 = vmatmul.f32.vlgmr.msrb.gmra.mxu2 %v951_v48  ;;  %384 = vmatpush.msra.mxu0 %v71_v4  ;;  %v173_v3 = vld [vmem:[%s1349_s1 + $0x4a8] sm:$0xff]  ;;  %v26_v4 = vld [vmem:[%s1349_s1 + $0x10] sm:$0xff] }
  0x46   :  { %425 = vmatpush.msra.mxu2 %v164_v5  ;;  %444 = vmatpush.msra.mxu3 %v215_v6  ;;  %v77_v5 = vld [vmem:[%s1349_s1 + $0x1a8] sm:$0xff]  ;;  %v170_v6 = vld [vmem:[%s1349_s1 + $0x490] sm:$0xff] }
  0x47   :  { %339 = vmatpush.msrb.mxu1 %v73_v7  ;;  %320 = vmatmul.f32.vlgmr.msrb.gmra.mxu0 %v968_v53  ;;  %v74_v7 = vld [vmem:[%s1349_s1 + $0x190] sm:$0xff] }
  0x48   :  { %380 = vmatmul.f32.vlgmr.msrb.gmra.mxu3 %v974_v54  ;;  %385 = vmatpush.msra.mxu0 %v68_v8  ;;  %v482_v8 = vld [vmem:[%s1351_s3 + $0x78] sm:$0xff] }
  0x49   :  { %404 = vmatpush.msra.mxu1 %v119_v9  ;;  %426 = vmatpush.msra.mxu2 %v161_v10  ;;  %v481_v9 = vld [vmem:[%s1351_s3 + $0x70] sm:$0xff]  ;;  %v480_v10 = vld [vmem:[%s1351_s3 + $0x68] sm:$0xff] }
  0x4a   :  { %445 = vmatpush.msra.mxu3 %v212_v11  ;;  %340 = vmatmul.f32.vlgmr.msrb.gmra.mxu1 %v992_v59  ;;  %v496_v11 = vld [vmem:[%s1351_s3 + $0xe8] sm:$0xff] }
  0x4b   :  { %386 = vmatpush.msra.mxu0 %v65_v12  ;;  %405 = vmatpush.msra.mxu1 %v116_v13  ;;  %v495_v12 = vld [vmem:[%s1351_s3 + $0xe0] sm:$0xff]  ;;  %v477_v13 = vld [vmem:[%s1351_s3 + $0x50] sm:$0xff] }
  0x4c   :  { %427 = vmatpush.msra.mxu2 %v158_v14  ;;  %446 = vmatpush.msra.mxu3 %v209_v15  ;;  %v494_v14 = vld [vmem:[%s1351_s3 + $0xd8] sm:$0xff]  ;;  %v476_v15 = vld [vmem:[%s1351_s3 + $0x48] sm:$0xff] }
  0x4d   :  { %387 = vmatpush.msra.mxu0 %v62_v16  ;;  %406 = vmatpush.msra.mxu1 %v113_v17  ;;  %v493_v16 = vld [vmem:[%s1351_s3 + $0xd0] sm:$0xff]  ;;  %v475_v17 = vld [vmem:[%s1351_s3 + $0x40] sm:$0xff] }
  0x4e   :  { %428 = vmatpush.msra.mxu2 %v155_v18  ;;  %447 = vmatpush.msra.mxu3 %v206_v19  ;;  %v492_v18 = vld [vmem:[%s1351_s3 + $0xc8] sm:$0xff]  ;;  %v474_v19 = vld [vmem:[%s1351_s3 + $0x38] sm:$0xff] }
  0x4f   :  { %388 = vmatpush.msra.mxu0 %v59_v20  ;;  %407 = vmatpush.msra.mxu1 %v110_v21  ;;  %v491_v20 = vld [vmem:[%s1351_s3 + $0xc0] sm:$0xff]  ;;  %v473_v21 = vld [vmem:[%s1351_s3 + $0x30] sm:$0xff] }
  0x50   :  { %429 = vmatpush.msra.mxu2 %v152_v22  ;;  %448 = vmatpush.msra.mxu3 %v203_v23  ;;  %v490_v22 = vld [vmem:[%s1351_s3 + $0xb8] sm:$0xff]  ;;  %v472_v23 = vld [vmem:[%s1351_s3 + $0x28] sm:$0xff] }
  0x51   :  { %389 = vmatpush.msra.mxu0 %v56_v24  ;;  %408 = vmatpush.msra.mxu1 %v107_v25  ;;  %v489_v24 = vld [vmem:[%s1351_s3 + $0xb0] sm:$0xff]  ;;  %v471_v25 = vld [vmem:[%s1351_s3 + $0x20] sm:$0xff] }
  0x52   :  { %430 = vmatpush.msra.mxu2 %v149_v26  ;;  %449 = vmatpush.msra.mxu3 %v200_v27  ;;  %v488_v26 = vld [vmem:[%s1351_s3 + $0xa8] sm:$0xff]  ;;  %v470_v27 = vld [vmem:[%s1351_s3 + $0x18] sm:$0xff] }
  0x53   :  { %390 = vmatpush.msra.mxu0 %v53_v28  ;;  %409 = vmatpush.msra.mxu1 %v104_v29  ;;  %v487_v28 = vld [vmem:[%s1351_s3 + $0xa0] sm:$0xff]  ;;  %v469_v29 = vld [vmem:[%s1351_s3 + $0x10] sm:$0xff] }
  0x54   :  { %431 = vmatpush.msra.mxu2 %v146_v30  ;;  %450 = vmatpush.msra.mxu3 %v197_v31  ;;  %v486_v30 = vld [vmem:[%s1351_s3 + $0x98] sm:$0xff]  ;;  %v468_v31 = vld [vmem:[%s1351_s3 + $0x8] sm:$0xff] }
  0x55   :  { %391 = vmatpush.msra.mxu0 %v50_v32  ;;  %410 = vmatpush.msra.mxu1 %v101_v33  ;;  %v485_v32 = vld [vmem:[%s1351_s3 + $0x90] sm:$0xff]  ;;  %v467_v33 = vld [vmem:[%s1351_s3] sm:$0xff] }
  0x56   :  { %432 = vmatpush.msra.mxu2 %v143_v34  ;;  %451 = vmatpush.msra.mxu3 %v194_v35  ;;  %v484_v34 = vld [vmem:[%s1351_s3 + $0x88] sm:$0xff]  ;;  %v483_v35 = vld [vmem:[%s1351_s3 + $0x80] sm:$0xff] }
  0x57   :  { %392 = vmatpush.msra.mxu0 %v47_v36  ;;  %411 = vmatpush.msra.mxu1 %v98_v37  ;;  %v506_v36 = vld [vmem:[%s1351_s3 + $0x138] sm:$0xff]  ;;  %v505_v37 = vld [vmem:[%s1351_s3 + $0x130] sm:$0xff] }
  0x58   :  { %433 = vmatpush.msra.mxu2 %v140_v38  ;;  %452 = vmatpush.msra.mxu3 %v191_v39  ;;  %v216_v38 = vld [vmem:[%s1353_s2] sm:$0x7] }
  0x59   :  { %393 = vmatpush.msra.mxu0 %v44_v40  ;;  %412 = vmatpush.msra.mxu1 %v95_v41  ;;  %v218_v39 = vperm.slane %v216_v38, 0 }
  0x5a   :  { %434 = vmatpush.msra.mxu2 %v137_v42  ;;  %453 = vmatpush.msra.mxu3 %v188_v43 }
  0x5b   :  { %394 = vmatpush.msra.mxu0 %v41_v44  ;;  %413 = vmatpush.msra.mxu1 %v92_v45 }
  0x5c   :  { %435 = vmatpush.msra.mxu2 %v134_v46  ;;  %454 = vmatpush.msra.mxu3 %v185_v47  ;;  %v219_v47 = vperm.slane %v216_v38, 1 }
  0x5d   :  { %395 = vmatpush.msra.mxu0 %v38_v49  ;;  %414 = vmatpush.msra.mxu1 %v89_v50  ;;  %v504_v50 = vld [vmem:[%s1351_s3 + $0x128] sm:$0xff] }
  0x5e   :  { %436 = vmatpush.msra.mxu2 %v131_v51  ;;  %455 = vmatpush.msra.mxu3 %v182_v52 }
  0x5f   :  { %396 = vmatpush.msra.mxu0 %v35_v55  ;;  %415 = vmatpush.msra.mxu1 %v86_v56  ;;  %v503_v56 = vld [vmem:[%s1351_s3 + $0x120] sm:$0xff] }
  0x60   :  { %437 = vmatpush.msra.mxu2 %v128_v57  ;;  %456 = vmatpush.msra.mxu3 %v179_v58  ;;  %v502_v58 = vld [vmem:[%s1351_s3 + $0x118] sm:$0xff] }
  0x61   :  { %397 = vmatpush.msra.mxu0 %v32_v60  ;;  %416 = vmatpush.msra.mxu1 %v83_v61 }
  0x62   :  { %438 = vmatpush.msra.mxu2 %v125_v62  ;;  %457 = vmatpush.msra.mxu3 %v176_v63  ;;  %v501_v62 = vld [vmem:[%s1351_s3 + $0x110] sm:$0xff] }
  0x63   :  { %398 = vmatpush.msra.mxu0 %v29_v0  ;;  %417 = vmatpush.msra.mxu1 %v80_v1  ;;  %v500_v1 = vld [vmem:[%s1351_s3 + $0x108] sm:$0xff] }
  0x64   :  { %439 = vmatpush.msra.mxu2 %v122_v2  ;;  %458 = vmatpush.msra.mxu3 %v173_v3  ;;  %v499_v3 = vld [vmem:[%s1351_s3 + $0x100] sm:$0xff] }
  0x65   :  { %440 = vmatmul.f32.vlgmr.msra.gmra.mxu2 %v951_v48  ;;  %399 = vmatpush.msra.mxu0 %v26_v4  ;;  %v498_v48 = vld [vmem:[%s1351_s3 + $0xf8] sm:$0xff] }
  0x66   :  { %418 = vmatpush.msra.mxu1 %v77_v5  ;;  %459 = vmatpush.msra.mxu3 %v170_v6  ;;  %v220_v5 = vperm.slane %v216_v38, 2 }
  0x67   :  { %400 = vmatmul.f32.vlgmr.msra.gmra.mxu0 %v968_v53  ;;  %460 = vmatmul.f32.vlgmr.msra.gmra.mxu3 %v974_v54  ;;  %v497_v53 = vld [vmem:[%s1351_s3 + $0xf0] sm:$0xff]  ;;  %v479_v54 = vld [vmem:[%s1351_s3 + $0x60] sm:$0xff] }
  0x68   :  { %419 = vmatpush.msra.mxu1 %v74_v7  ;;  %515 = vmatpush.msrb.mxu0 %v482_v8 }
  0x69   :  { %420 = vmatmul.f32.vlgmr.msra.gmra.mxu1 %v992_v59  ;;  %v478_v59 = vld [vmem:[%s1351_s3 + $0x58] sm:$0xff]  ;;  %563 = vmatpush.msrb.mxu2 %v506_v36 }
  0x6a   :  { %516 = vmatpush.msrb.mxu0 %v481_v9  ;;  %535 = vmatpush.msrb.mxu1 %v498_v48 }
  0x6b   :  { %564 = vmatpush.msrb.mxu2 %v505_v37 }
  0x6c   :  { %517 = vmatpush.msrb.mxu0 %v480_v10  ;;  %536 = vmatpush.msrb.mxu1 %v497_v53 }
  0x6d   :  { %565 = vmatpush.msrb.mxu2 %v504_v50 }
  0x6e   :  { %518 = vmatpush.msrb.mxu0 %v479_v54  ;;  %537 = vmatpush.msrb.mxu1 %v496_v11 }
  0x6f   :  { %566 = vmatpush.msrb.mxu2 %v503_v56 }
  0x70   :  { %519 = vmatpush.msrb.mxu0 %v478_v59  ;;  %538 = vmatpush.msrb.mxu1 %v495_v12  ;;  %v581_v59 = vld [vmem:[%s1352_s4] ss:$0 sm:$0xff] }
  0x71   :  { %567 = vmatpush.msrb.mxu2 %v502_v58 }
  0x72   :  { %520 = vmatpush.msrb.mxu0 %v477_v13  ;;  %539 = vmatpush.msrb.mxu1 %v494_v14 }
  0x73   :  { %568 = vmatpush.msrb.mxu2 %v501_v62 }
  0x74   :  { %521 = vmatpush.msrb.mxu0 %v476_v15  ;;  %540 = vmatpush.msrb.mxu1 %v493_v16 }
  0x75   :  { %569 = vmatpush.msrb.mxu2 %v500_v1 }
  0x76   :  { %522 = vmatpush.msrb.mxu0 %v475_v17  ;;  %541 = vmatpush.msrb.mxu1 %v492_v18 }
  0x77   :  { %570 = vmatpush.msrb.mxu2 %v499_v3 }
  0x78   :  { %523 = vmatpush.msrb.mxu0 %v474_v19  ;;  %542 = vmatpush.msrb.mxu1 %v491_v20 }
  0x7a   :  { %524 = vmatpush.msrb.mxu0 %v473_v21  ;;  %543 = vmatpush.msrb.mxu1 %v490_v22 }
  0x7c   :  { %525 = vmatpush.msrb.mxu0 %v472_v23  ;;  %544 = vmatpush.msrb.mxu1 %v489_v24 }
  0x7e   :  { %526 = vmatpush.msrb.mxu0 %v471_v25  ;;  %545 = vmatpush.msrb.mxu1 %v488_v26 }
  0x80   :  { %527 = vmatpush.msrb.mxu0 %v470_v27  ;;  %546 = vmatpush.msrb.mxu1 %v487_v28 }
  0x82   :  { %528 = vmatpush.msrb.mxu0 %v469_v29  ;;  %547 = vmatpush.msrb.mxu1 %v486_v30 }
  0x84   :  { %529 = vmatpush.msrb.mxu0 %v468_v31  ;;  %548 = vmatpush.msrb.mxu1 %v485_v32 }
  0x86   :  { %530 = vmatpush.msrb.mxu0 %v467_v33  ;;  %549 = vmatpush.msrb.mxu1 %v484_v34 }
  0x88   :  { %550 = vmatpush.msrb.mxu1 %v483_v35 }
  0xba   :  { %v241_v40 = vpop.f32.mrf.mxu0 }
  0xbb   :  { %v242_v41 = vadd.f32 %v241_v40, %v218_v39 }
  0xbd   :  { %v261_v42 = vpop.f32.mrf.mxu1 }
  0xbe   :  { %v262_v43 = vadd.f32 %v261_v42, %v242_v41  ;;  %v281_v44 = vpop.f32.mrf.mxu2 }
  0xc0   :  { %v282_v45 = vadd.f32 %v281_v44, %v262_v43 }
  0xc1   :  { %v301_v46 = vpop.f32.mrf.mxu3 }
  0xc2   :  { %v302_v49 = vadd.f32 %v301_v46, %v282_v45 }
  0xc4   :  { %v464_v51 = vmax.f32 %v302_v49, 0.0  ;;  %v321_v52 = vpop.f32.mrf.mxu0 }
  0xc5   :  { %v322_v55 = vadd.f32 %v321_v52, %v219_v47 }
  0xc6   :  { %531 = vmatmul.f32.vlgmr.msrb.gmra.mxu0 %v464_v51 }
  0xc7   :  { %v341_v57 = vpop.f32.mrf.mxu1 }
  0xc8   :  { %v342_v60 = vadd.f32 %v341_v57, %v322_v55  ;;  %v361_v61 = vpop.f32.mrf.mxu2 }
  0xca   :  { %v362_v63 = vadd.f32 %v361_v61, %v342_v60 }
  0xcb   :  { %v381_v0 = vpop.f32.mrf.mxu3 }
  0xcc   :  { %v382_v2 = vadd.f32 %v381_v0, %v362_v63 }
  0xce   :  { %v465_v4 = vmax.f32 %v382_v2, 0.0 }
  0xd0   :  { %551 = vmatmul.f32.vlgmr.msrb.gmra.mxu1 %v465_v4 }
  0xe4   :  { %v401_v6 = vpop.f32.mrf.mxu0 }
  0xe5   :  { %v402_v7 = vadd.f32 %v401_v6, %v220_v5 }
  0xe6   :  { %v421_v8 = vpop.f32.mrf.mxu1 }
  0xe7   :  { %v422_v9 = vadd.f32 %v421_v8, %v402_v7 }
  0xe8   :  { %v441_v48 = vpop.f32.mrf.mxu2 }
  0xe9   :  { %v442_v10 = vadd.f32 %v441_v48, %v422_v9 }
  0xea   :  { %v461_v53 = vpop.f32.mrf.mxu3 }
  0xeb   :  { %v462_v54 = vadd.f32 %v461_v53, %v442_v10 }
  0xed   :  { %v466_v11 = vmax.f32 %v462_v54, 0.0 }
  0xef   :  { %580 = vmatmul.msk.f32.vlgmr.msrb.gmra.mxu2 %vm511_vm0, %v466_v11 }
 0x143   :  { %v532_v12 = vpop.f32.mrf.mxu0 }
 0x144   :  { %v533_v13 = vadd.f32 %v581_v59, %v532_v12 }
 0x14d   :  { %v552_v14 = vpop.f32.mrf.mxu1 }
 0x14e   :  { %v553_v15 = vadd.f32 %v552_v14, %v533_v13 }
 0x172   :  { %v572_v16 = vpop.f32.mrf.mxu2 }
 0x173   :  { %v573_v17 = vadd.f32 %v572_v16, %v553_v15 }
 0x175   :  { %575 = vst [vmem:[%s1354_s5] sm:$0xff] %v573_v17 }

</bundles_post_ra>
